<compile_context>
chip_gen: v6e
topology: v6e:2x2x1
jax: 0.10.0
libtpu: 0.0.40
codegen_flags: <defaults>
</compile_context>

<pallas_src>
import jax
import jax.numpy as jnp
from jax.experimental import pallas as pl
from jax.experimental.pallas import tpu as pltpu  # noqa: F401  (kept for TPU-specific tuning hooks)

LN_EPS = 1e-5


def _q_ensemble_kernel(x_ref, w_ref, b_ref, o_ref):
    # x_ref: (B, F)        input
    # w_ref: (F, N_pad)    fused (gamma-folded) weights for all heads, lane-padded
    # b_ref: (1, N_pad)    fused biases (b + beta @ W), lane-padded
    # o_ref: (B, N_pad)    lane-dense output slab
    x = x_ref[...]                                           # f32 already

    # LayerNorm over features (biased variance, eps=1e-5 -> matches torch.nn.LayerNorm).
    # Computed ONCE for all heads (it is head-independent).
    mu = jnp.mean(x, axis=-1, keepdims=True)
    var = jnp.mean((x - mu) * (x - mu), axis=-1, keepdims=True)
    xn = (x - mu) * jax.lax.rsqrt(var + LN_EPS)              # (B, F)

    # Single MXU matmul covering every head; gamma/beta already folded into w/b.
    o_ref[...] = (
        jnp.dot(xn, w_ref[...], preferred_element_type=jnp.float32) + b_ref[...]
    )


def q_ensemble_forward(x, gamma, beta, w, b):
    """Pallas QEnsemble forward.

    Args:
      x:     (B, F) float32
      gamma: (H, F) LayerNorm weights, one row per head
      beta:  (H, F) LayerNorm biases
      w:     (H, F, A) Linear weights, pre-transposed so y @ w[h] works
      b:     (H, A) Linear biases
    Returns:
      (B, A, H) float32 — matches torch.stack([head(x) for head in q_heads], dim=-1)
    """
    B, F = x.shape
    H, _, A = w.shape
    N = H * A
    N_pad = ((N + 127) // 128) * 128        # pad fused output dim to full 128-lane tiles

    # --- One-time f32 folding of the per-head LayerNorm affine into the linear ---
    # W'[h] = gamma[h][:, None] * W[h];  b'[h] = b[h] + beta[h] @ W[h]
    w_fused = gamma[:, :, None] * w                                  # (H, F, A)
    w_fused = jnp.transpose(w_fused, (1, 0, 2)).reshape(F, N)        # (F, H*A)
    b_fused = (jnp.einsum("hf,hfa->ha", beta, w) + b).reshape(1, N)  # (1, H*A), f32

    # Lane-pad so the kernel's store is an unmasked full-lane vst.
    w_fused = jnp.pad(w_fused, ((0, 0), (0, N_pad - N)))
    b_fused = jnp.pad(b_fused, ((0, 0), (0, N_pad - N)))

    out_flat = pl.pallas_call(
        _q_ensemble_kernel,
        out_shape=jax.ShapeDtypeStruct((B, N_pad), jnp.float32),
        grid=(1,),
        in_specs=[
            pl.BlockSpec((B, F), lambda i: (0, 0)),        # x (full)
            pl.BlockSpec((F, N_pad), lambda i: (0, 0)),    # fused weights
            pl.BlockSpec((1, N_pad), lambda i: (0, 0)),    # fused bias
        ],
        out_specs=pl.BlockSpec((B, N_pad), lambda i: (0, 0)),
    )(x, w_fused, b_fused)

    # (B, H*A) -> (B, H, A) -> (B, A, H)
    out = out_flat[:, :N].reshape(B, H, A)
    return jnp.transpose(out, (0, 2, 1))


def init_params(key, n_input_features, n_actions, n_heads):
    """Deterministic synthetic parameters (shapes match the PyTorch module)."""
    k_w, k_b, k_g, k_be = jax.random.split(key, 4)
    # Use non-trivial gamma/beta so the affine-folding path is actually exercised.
    gamma = 1.0 + 0.1 * jax.random.normal(k_g, (n_heads, n_input_features), jnp.float32)
    beta = 0.1 * jax.random.normal(k_be, (n_heads, n_input_features), jnp.float32)
    # Linear init: uniform(-bound, bound), bound = 1/sqrt(fan_in) (PyTorch default).
    bound = 1.0 / jnp.sqrt(float(n_input_features))
    w = jax.random.uniform(
        k_w, (n_heads, n_input_features, n_actions), jnp.float32, -bound, bound
    )
    b = jax.random.uniform(k_b, (n_heads, n_actions), jnp.float32, -bound, bound)
    return gamma, beta, w, b


def reference_forward(x, gamma, beta, w, b):
    """Pure-JAX reference: per-head LayerNorm + Linear, stacked on last dim."""
    mu = jnp.mean(x, axis=-1, keepdims=True)
    var = jnp.mean((x - mu) ** 2, axis=-1, keepdims=True)
    xn = (x - mu) / jnp.sqrt(var + LN_EPS)
    y = xn[None, :, :] * gamma[:, None, :] + beta[:, None, :]   # (H, B, F)
    out = jnp.einsum("hbf,hfa->hba", y, w) + b[:, None, :]      # (H, B, A)
    return jnp.transpose(out, (1, 2, 0))                        # (B, A, H)


# TODO(synk): get_loss / log are training-time bookkeeping (TD targets, Theil index)
# and are not part of the forward pass; only forward() is implemented as a kernel.

if __name__ == "__main__":
    # Small shapes consistent with the module's forward.
    batch = 8
    n_input_features = 32
    n_actions = 4
    n_heads = 10

    key = jax.random.PRNGKey(0)
    k_x, k_p = jax.random.split(key)
    x = jax.random.normal(k_x, (batch, n_input_features), jnp.float32)
    gamma, beta, w, b = init_params(k_p, n_input_features, n_actions, n_heads)

    out = q_ensemble_forward(x, gamma, beta, w, b)
    out = jax.block_until_ready(out)

    assert out.shape == (batch, n_actions, n_heads), out.shape

    ref = reference_forward(x, gamma, beta, w, b)
    max_err = float(jnp.max(jnp.abs(out - ref)))
    assert jnp.allclose(out, ref, atol=1e-4, rtol=1e-4), max_err

    print("KERNEL_OK")
</pallas_src>

<mosaic_0001>
module attributes {stable_mosaic.version = 11 : i64} {
  func.func @_q_ensemble_kernel(%arg0: i32, %arg1: memref<8x32xf32, #tpu.memory_space<vmem>>, %arg2: memref<32x128xf32, #tpu.memory_space<vmem>>, %arg3: memref<1x128xf32, #tpu.memory_space<vmem>>, %arg4: memref<8x128xf32, #tpu.memory_space<vmem>>) attributes {dimension_semantics = [#tpu.dimension_semantics<arbitrary>], iteration_bounds = array<i64: 1>, scalar_prefetch = 0 : i64, scratch_operands = 0 : i64, tpu.core_type = #tpu.core_type<tc>, window_params = [{pipeline_mode = #tpu.pipeline_mode<synchronous>, transform_indices = @transform_0, window_bounds = array<i64: 8, 32>}, {pipeline_mode = #tpu.pipeline_mode<synchronous>, transform_indices = @transform_1, window_bounds = array<i64: 32, 128>}, {pipeline_mode = #tpu.pipeline_mode<synchronous>, transform_indices = @transform_2, window_bounds = array<i64: 1, 128>}, {pipeline_mode = #tpu.pipeline_mode<synchronous>, transform_indices = @transform_3, window_bounds = array<i64: 8, 128>}]} {
    %c0 = arith.constant 0 : index
    %c0_0 = arith.constant 0 : index
    %0 = vector.load %arg1[%c0, %c0_0] : memref<8x32xf32, #tpu.memory_space<vmem>>, vector<8x32xf32>
    %cst = arith.constant dense<0.000000e+00> : vector<8xf32>
    %1 = vector.multi_reduction <add>, %0, %cst [1] : vector<8x32xf32> to vector<8xf32>
    %2 = vector.shape_cast %1 : vector<8xf32> to vector<8x1xf32>
    %cst_1 = arith.constant 3.200000e+01 : f32
    %3 = vector.broadcast %cst_1 : f32 to vector<8x1xf32>
    %4 = arith.divf %2, %3 : vector<8x1xf32>
    %5 = vector.broadcast %4 : vector<8x1xf32> to vector<8x32xf32>
    %6 = arith.subf %0, %5 : vector<8x32xf32>
    %7 = vector.broadcast %4 : vector<8x1xf32> to vector<8x32xf32>
    %8 = arith.subf %0, %7 : vector<8x32xf32>
    %9 = arith.mulf %6, %8 : vector<8x32xf32>
    %cst_2 = arith.constant dense<0.000000e+00> : vector<8xf32>
    %10 = vector.multi_reduction <add>, %9, %cst_2 [1] : vector<8x32xf32> to vector<8xf32>
    %11 = vector.shape_cast %10 : vector<8xf32> to vector<8x1xf32>
    %cst_3 = arith.constant 3.200000e+01 : f32
    %12 = vector.broadcast %cst_3 : f32 to vector<8x1xf32>
    %13 = arith.divf %11, %12 : vector<8x1xf32>
    %14 = vector.broadcast %4 : vector<8x1xf32> to vector<8x32xf32>
    %15 = arith.subf %0, %14 : vector<8x32xf32>
    %cst_4 = arith.constant 9.99999974E-6 : f32
    %16 = vector.broadcast %cst_4 : f32 to vector<8x1xf32>
    %17 = arith.addf %13, %16 : vector<8x1xf32>
    %18 = math.rsqrt %17 : vector<8x1xf32>
    %19 = vector.broadcast %18 : vector<8x1xf32> to vector<8x32xf32>
    %20 = arith.mulf %15, %19 : vector<8x32xf32>
    %c0_5 = arith.constant 0 : index
    %c0_6 = arith.constant 0 : index
    %21 = vector.load %arg2[%c0_5, %c0_6] : memref<32x128xf32, #tpu.memory_space<vmem>>, vector<32x128xf32>
    %cst_7 = arith.constant dense<0.000000e+00> : vector<8x128xf32>
    %22 = tpu.matmul %20, %21, %cst_7 {dimension_numbers = #tpu.dot_dimension_numbers<[1], [0], [0], [1], [0, 0, 1, 1], [], []>} : vector<8x32xf32>, vector<32x128xf32>, vector<8x128xf32> -> vector<8x128xf32>
    %c0_8 = arith.constant 0 : index
    %c0_9 = arith.constant 0 : index
    %23 = vector.load %arg3[%c0_8, %c0_9] : memref<1x128xf32, #tpu.memory_space<vmem>>, vector<1x128xf32>
    %24 = vector.broadcast %23 : vector<1x128xf32> to vector<8x128xf32>
    %25 = arith.addf %22, %24 : vector<8x128xf32>
    %c0_10 = arith.constant 0 : index
    %c0_11 = arith.constant 0 : index
    %26 = vector.load %arg4[%c0_10, %c0_11] : memref<8x128xf32, #tpu.memory_space<vmem>>, vector<8x128xf32>
    tpu.vector_store %arg4[%c0_10, %c0_11], %25 {strides = array<i32>} : memref<8x128xf32, #tpu.memory_space<vmem>>, vector<8x128xf32>,
    return
  }
  func.func @transform_0(%arg0: i32) -> (i32, i32) {
    %c0_i32 = arith.constant 0 : i32
    %c0_i32_0 = arith.constant 0 : i32
    %c0_i32_1 = arith.constant 0 : i32
    return %c0_i32, %c0_i32_0 : i32, i32
  }
  func.func @transform_1(%arg0: i32) -> (i32, i32) {
    %c0_i32 = arith.constant 0 : i32
    %c0_i32_0 = arith.constant 0 : i32
    %c0_i32_1 = arith.constant 0 : i32
    return %c0_i32, %c0_i32_0 : i32, i32
  }
  func.func @transform_2(%arg0: i32) -> (i32, i32) {
    %c0_i32 = arith.constant 0 : i32
    %c0_i32_0 = arith.constant 0 : i32
    %c0_i32_1 = arith.constant 0 : i32
    return %c0_i32, %c0_i32_0 : i32, i32
  }
  func.func @transform_3(%arg0: i32) -> (i32, i32) {
    %c0_i32 = arith.constant 0 : i32
    %c0_i32_0 = arith.constant 0 : i32
    %c0_i32_1 = arith.constant 0 : i32
    return %c0_i32, %c0_i32_0 : i32, i32
  }
}

</mosaic_0001>

<bundles_post_ra>
// kernel: tpu_custom_call.1
= control target key start
LH: loop header
LB: loop body
LE: loop exit
PB: predicated region body
PF: predicated region fallthrough
CT: control target
= control target key end

     0   :  { %8 = vsyncpa [#allocation3], 0  ;;  %s293_s0 = inlined_call_operand.hbm [shape: f32[8,32], index: 0, kind: input, shape index: {}]   ;;  %s294_s1 = inlined_call_operand.hbm [shape: f32[32,128], index: 1, kind: input, shape index: {}]   ;;  %s295_s2 = inlined_call_operand.vmem [shape: f32[1,128], index: 2, kind: input, shape index: {}]   ;;  %s296_s3 = inlined_call_operand.hbm [shape: f32[8,128], index: 3, kind: output, shape index: {}]  }
   0x1   :  { %9 = vsyncpa [#allocation6], 0 }
   0x2   :  { %10 = vsyncpa [#allocation4], 0  ;;  %s251_s12 = smov [#allocation2]   ;;  %s252_s14 = smov [#allocation5]  }
   0x3   :  { %s17_s13 = sshll.u32 %s251_s12, 4  ;;  %s26_s15 = sshll.u32 %s252_s14, 4  ;;  %s18_s13 = int_to_ptr.vmem [resolvable:$true] %s17_s13  ;;  %s27_s15 = int_to_ptr.vmem [resolvable:$true] %s26_s15 }
   0x4   :  { %s193_s16 = scalar_lea.vmem %s18_s13, 128  ;;  %p198_p1 = scmp.lt.s32.totalorder %s18_s13, %s18_s13 }
   0x5   :  { %p194_p0 = scmp.ne.s32.totalorder %s18_s13, %s193_s16  ;;  %p199_p2 = scmp.lt.s32.totalorder %s193_s16, %s193_s16 }
   0x7   :  { %p200_p3 = por %p199_p2, %p198_p1 }
   0x9   :  { %p201_p4 = pnand %p200_p3, %p194_p0 }
   0xb   :  { %204 = shalt.err (!%p201_p4)
}
   0xc   :  { %20 = dma.hbm_to_vmem [thread:$0]  %s293_s0, 128, %s18_s13, [#allocation3]  }
   0xd   :  { %s213_s19 = scalar_lea.vmem %s27_s15, 512  ;;  %p218_p6 = scmp.lt.s32.totalorder %s27_s15, %s27_s15 }
   0xe   :  { %p214_p5 = scmp.ne.s32.totalorder %s27_s15, %s213_s19  ;;  %p219_p7 = scmp.lt.s32.totalorder %s213_s19, %s213_s19 }
  0x10   :  { %p220_p8 = por %p219_p7, %p218_p6 }
  0x12   :  { %p221_p9 = pnand %p220_p8, %p214_p5 }
  0x14   :  { %224 = shalt.err (!%p221_p9)
}
  0x15   :  { %s253_s20 = smov 128   ;;  %s254_s21 = smov 8  }
  0x16   :  { %32 = dma.hbm_to_vmem [thread:$0]  %s294_s1, 512, %s27_s15, [#allocation6], %s253_s20, %s253_s20, %s254_s21  }
  0x17   :  { %245 = dma.done.wait [#allocation3], 128  }
  0x18   :  { %246 = vsyncadd [#allocation3], 4294967168 }
  0x19   :  { %247 = dma.done.wait [#allocation6], 512  }
  0x1a   :  { %248 = vsyncadd [#allocation6], 4294966784  ;;  %vm42_vm0 = vcmask 261120   ;;  %v41_v0 = vld [vmem:[#allocation2] sm:$0xff]  ;;  %v255_v8 = vmov 0.0   ;;  %v59_v9 = vld [vmem:[#allocation5 + $0x10] sm:$0xff] }
  0x1b   :  { %v43_v1 = vsel %vm42_vm0, %v41_v0, 0.0  ;;  %v60_v7 = vld [vmem:[#allocation5 + $0x18] sm:$0xff]  ;;  %165 = vmatprep.subr.mxu0 %v255_v8  ;;  %vm256_vm1 = vmmov 0   ;;  %v58_v10 = vld [vmem:[#allocation5 + $0x8] sm:$0xff]  ;;  %v57_v11 = vld [vmem:[#allocation5] sm:$0xff]  ;;  %s257_s24 = smov [#allocation7]  }
  0x1c   :  { %44 = vadd.xlane.f32.xlu0 %v43_v1  ;;  %173 = vmatprep.mubr.msk.f32.mxu0 %vm256_vm1, %v255_v8  ;;  %v158_v17 = vld [vmem:[%s295_s2] ss:$0 sm:$0xff]  ;;  %s148_s25 = sshll.u32 %s257_s24, 4  ;;  %s149_s25 = int_to_ptr.vmem [resolvable:$true] %s148_s25 }
  0x1d   :  { %166 = vmatpush3.msra.mxu0 %v60_v7  ;;  %s225_s26 = scalar_lea.vmem %s149_s25, 128  ;;  %p230_p11 = scmp.lt.s32.totalorder %s149_s25, %s149_s25 }
  0x1e   :  { %167 = vmatprep.subr.mxu0 %v255_v8  ;;  %p226_p10 = scmp.ne.s32.totalorder %s149_s25, %s225_s26  ;;  %p231_p12 = scmp.lt.s32.totalorder %s225_s26, %s225_s26 }
  0x1f   :  { %168 = vmatpush3.msra.mxu0 %v59_v9 }
  0x20   :  { %169 = vmatprep.subr.mxu0 %v255_v8  ;;  %p232_p13 = por %p231_p12, %p230_p11 }
  0x21   :  { %170 = vmatpush3.msra.mxu0 %v58_v10 }
  0x22   :  { %171 = vmatprep.subr.mxu0 %v255_v8  ;;  %p233_p0 = pnand %p232_p13, %p226_p10 }
  0x23   :  { %172 = vmatpush3.msra.mxu0 %v57_v11 }
  0xa5   :  { %v45_v2 = vpop.xlane.xlu0 %44 }
  0xa6   :  { %v47_v3 = vmul.f32 0.03125, %v45_v2 }
  0xa8   :  { %v48_v4 = vsub.f32 %v41_v0, %v47_v3 }
  0xaa   :  { %v49_v5 = vmul.f32 %v48_v4, %v48_v4 }
  0xac   :  { %v50_v6 = vsel %vm42_vm0, %v49_v5, 0.0 }
  0xad   :  { %51 = vadd.xlane.f32.xlu0 %v50_v6 }
 0x136   :  { %v52_v12 = vpop.xlane.xlu0 %51 }
 0x137   :  { %v53_v13 = vmul.f32 0.03125, %v52_v12 }
 0x139   :  { %v54_v14 = vadd.f32 1e-05, %v53_v13 }
 0x13b   :  { %183 = vrsqrt.f32 %v54_v14 }
 0x148   :  { %v184_v15 = vpop.eup %183 }
 0x149   :  { %v56_v16 = vmul.f32 %v184_v15, %v48_v4 }
 0x14b   :  { %174 = vmatmul.mubr.msk.f32.vlgmr.msra.gmra.mxu0 %vm42_vm0, %v56_v16 }
 0x20b   :  { %v137_v18 = vpop.f32.mrf.mxu0 }
 0x20c   :  { %v138_v19 = vadd.f32 %v158_v17, %v137_v18 }
 0x20d   :  { %v175_v20 = vpop.f32.mrf.mxu0 }
 0x20e   :  { %141 = vst [vmem:[#allocation7] sm:$0xff] %v138_v19 }
 0x20f   :  { %236 = shalt.err (!%p233_p0)
}
 0x210   :  { %151 = dma.vmem_to_hbm [thread:$0]  %s149_s25, 128, %s296_s3, [#allocation4]  }
 0x211   :  { %249 = dma.done.wait [#allocation4], 128  }
 0x212   :  { %250 = vsyncadd [#allocation4], 4294967168 }
 0x213   :  { %155 = vsyncpa [#allocation3], 1 }
 0x214   :  { %156 = vsyncpa [#allocation6], 1 }
 0x215   :  { %157 = vsyncpa [#allocation4], 1 }

</bundles_post_ra>
